<compile_context>
chip_gen: v6e
topology: v6e:2x2x1
jax: 0.10.0
libtpu: 0.0.40
codegen_flags: <defaults>
</compile_context>

<pallas_src>
import jax
import jax.numpy as jnp
from jax import lax
from jax.experimental import pallas as pl
from jax.experimental.pallas import tpu as pltpu


VARIANCE_EPS = 1e-12


def _round_up(x, m):
    return ((x + m - 1) // m) * m


def _pick_tile(n_tok, tokens_per_tile):
    """Largest T that divides n_tok, is a multiple of 8 (or the full extent), fits the
    requested cap, and (when possible) leaves >= 2 tiles so ("parallel",) can shard across
    both TensorCores on v7x.  Returns None if no such T exists (-> padded fallback)."""
    cap = min(tokens_per_tile, n_tok)
    half = (n_tok // 2) // 8 * 8
    if half >= 8:
        cap = min(cap, max(half, 8))
    for T in range(cap, 0, -1):
        if n_tok % T == 0 and (T % 8 == 0 or T == n_tok):
            return T
    return None


def _make_kernel(v_rows):
    """Kernel closure; v_rows = number of token-table rows (segment rows are offset by it)."""

    def kernel(tok_ids_ref, seg_ids_ref,   # (T, 1) int32 id columns (VMEM)
               tab_ref,                    # (V+NS, D) fused table, VMEM-resident
               gamma_ref, beta_ref,        # (1, D) affine params, VMEM-resident
               o_ref):                     # (T, D) output tile
        T, D = o_ref.shape
        R = tab_ref.shape[0]               # V + NS

        tok_ids = tok_ids_ref[...]                     # (T, 1)
        seg_ids = seg_ids_ref[...] + v_rows            # (T, 1), offset into fused table

        # Single fused one-hot gather on the MXU: exactly two 1s per row (tok row, seg row),
        # so onehot @ table == tok_table[x] + seg_table[seg].
        row_iota = lax.broadcasted_iota(jnp.int32, (T, R), 1)
        one_hot = jnp.logical_or(tok_ids == row_iota, seg_ids == row_iota)
        e = jnp.dot(one_hot.astype(tab_ref.dtype), tab_ref[...],
                    preferred_element_type=jnp.float32)

        # TF-style LayerNorm (epsilon inside the square root); rsqrt on the EUP,
        # sums scaled by a 1/D constant instead of vector divides.
        inv_d = jnp.float32(1.0 / D)
        u = jnp.sum(e, axis=-1, keepdims=True) * inv_d
        d = e - u
        s = jnp.sum(d * d, axis=-1, keepdims=True) * inv_d
        xhat = d * lax.rsqrt(s + VARIANCE_EPS)

        o_ref[...] = (gamma_ref[...] * xhat + beta_ref[...]).astype(o_ref.dtype)

    return kernel


def embeddings_forward(x_ids, seg_ids, tok_table, seg_table, gamma, beta,
                       *, tokens_per_tile=1024, out_dtype=jnp.float32):
    """x_ids, seg_ids: (B, S) int ids.  Returns (B, S, D) in out_dtype."""
    B, S = x_ids.shape
    V, D = tok_table.shape
    NS = seg_table.shape[0]
    n_tok = B * S

    tok_flat = x_ids.reshape(-1).astype(jnp.int32)
    seg_flat = seg_ids.reshape(-1).astype(jnp.int32)

    T = _pick_tile(n_tok, tokens_per_tile)
    if T is not None:
        n_pad = n_tok                                   # no padding, no output slice
    else:
        # Fallback for awkward token counts: pad the flattened stream (extra slice at end).
        T = min(tokens_per_tile, _round_up(n_tok, 8))
        n_pad = pl.cdiv(n_tok, T) * T
        tok_flat = jnp.zeros((n_pad,), jnp.int32).at[:n_tok].set(tok_flat)
        seg_flat = jnp.zeros((n_pad,), jnp.int32).at[:n_tok].set(seg_flat)
    n_tiles = n_pad // T

    tok_col = tok_flat.reshape(n_pad, 1)
    seg_col = seg_flat.reshape(n_pad, 1)

    # Fused gather table: rows [0, V) = token embeddings, rows [V, V+NS) = segment embeddings.
    full_table = jnp.concatenate([tok_table, seg_table.astype(tok_table.dtype)], axis=0)
    R = V + NS

    gamma2 = gamma.reshape(1, D).astype(jnp.float32)
    beta2 = beta.reshape(1, D).astype(jnp.float32)

    grid_spec = pl.GridSpec(
        grid=(n_tiles,),
        in_specs=[
            pl.BlockSpec((T, 1), lambda i: (i, 0)),     # token ids for this tile
            pl.BlockSpec((T, 1), lambda i: (i, 0)),     # segment ids for this tile
            pl.BlockSpec((R, D), lambda i: (0, 0)),     # fused table (VMEM-resident)
            pl.BlockSpec((1, D), lambda i: (0, 0)),     # gamma (VMEM-resident)
            pl.BlockSpec((1, D), lambda i: (0, 0)),     # beta (VMEM-resident)
        ],
        out_specs=pl.BlockSpec((T, D), lambda i: (i, 0)),
    )

    out_itemsize = jnp.dtype(out_dtype).itemsize
    tab_itemsize = full_table.dtype.itemsize
    cost = pl.CostEstimate(
        flops=2 * n_pad * R * D + 10 * n_pad * D,       # one-hot matmul + LN epilogue
        transcendentals=n_pad,                           # one rsqrt per token row
        bytes_accessed=(n_pad * D * out_itemsize        # output writeback (dominant)
                        + 2 * n_pad * 4                 # id columns
                        + R * D * tab_itemsize          # table (read once, resident)
                        + 2 * D * 4),
    )

    # Rough per-step VMEM budget: double-buffered output + ids, one-hot temp, resident table.
    vmem_est = (2 * T * D * 4 + T * R * 4 + 4 * T * 4
                + 2 * R * D * tab_itemsize + 2 * 2 * D * 4)
    compiler_kwargs = dict(dimension_semantics=("parallel",))   # independent output tiles
    if vmem_est > 30 * 1024 * 1024:
        # Only needed when T/D are pushed far past the demo sizes (v5e 16 MiB / v7x 32 MiB
        # scoped defaults); cap at v7x-safe 64 MiB.
        compiler_kwargs["vmem_limit_bytes"] = min(int(vmem_est * 3 // 2), 64 * 1024 * 1024)

    out_flat = pl.pallas_call(
        _make_kernel(V),
        out_shape=jax.ShapeDtypeStruct((n_pad, D), out_dtype),
        grid_spec=grid_spec,
        compiler_params=pltpu.CompilerParams(**compiler_kwargs),
        cost_estimate=cost,
    )(tok_col, seg_col, full_table, gamma2, beta2)

    if n_pad != n_tok:
        out_flat = out_flat[:n_tok]
    return out_flat.reshape(B, S, D)


def reference_forward(x_ids, seg_ids, tok_table, seg_table, gamma, beta):
    e = tok_table[x_ids] + seg_table[seg_ids]
    u = jnp.mean(e, axis=-1, keepdims=True)
    s = jnp.mean((e - u) ** 2, axis=-1, keepdims=True)
    xhat = (e - u) / jnp.sqrt(s + VARIANCE_EPS)
    return gamma * xhat + beta


if __name__ == "__main__":
    # cfg: vocab_size=32, max_len=16, n_segments=2, dim=128
    vocab_size, max_len, n_segments, dim = 32, 16, 2, 128
    B, S = 2, 8

    key = jax.random.PRNGKey(0)
    k_tok, k_pos, k_seg, k_x, k_s = jax.random.split(key, 5)

    tok_table = jax.random.normal(k_tok, (vocab_size, dim), dtype=jnp.float32) * 0.02
    pos_table = jax.random.normal(k_pos, (max_len, dim), dtype=jnp.float32) * 0.02  # unused in forward
    seg_table = jax.random.normal(k_seg, (n_segments, dim), dtype=jnp.float32) * 0.02
    gamma = jnp.ones((dim,), dtype=jnp.float32)
    beta = jnp.zeros((dim,), dtype=jnp.float32)

    x_ids = jax.random.randint(k_x, (B, S), 0, vocab_size, dtype=jnp.int32)
    seg_ids = jax.random.randint(k_s, (B, S), 0, n_segments, dtype=jnp.int32)

    out = embeddings_forward(x_ids, seg_ids, tok_table, seg_table, gamma, beta)
    out = jax.block_until_ready(out)

    ref = reference_forward(x_ids, seg_ids, tok_table, seg_table, gamma, beta)
    assert out.shape == (B, S, dim)
    assert jnp.allclose(out, ref, atol=1e-5, rtol=1e-5), "mismatch vs JAX reference"

    print("KERNEL_OK")
</pallas_src>

<mosaic_0001>
module attributes {stable_mosaic.version = 11 : i64} {
  func.func @kernel(%arg0: i32, %arg1: memref<8x1xi32, #tpu.memory_space<vmem>>, %arg2: memref<8x1xi32, #tpu.memory_space<vmem>>, %arg3: memref<34x128xf32, #tpu.memory_space<vmem>>, %arg4: memref<1x128xf32, #tpu.memory_space<vmem>>, %arg5: memref<1x128xf32, #tpu.memory_space<vmem>>, %arg6: memref<8x128xf32, #tpu.memory_space<vmem>>) attributes {dimension_semantics = [#tpu.dimension_semantics<parallel>], iteration_bounds = array<i64: 2>, scalar_prefetch = 0 : i64, scratch_operands = 0 : i64, tpu.core_type = #tpu.core_type<tc>, window_params = [{transform_indices = @transform_0, window_bounds = array<i64: 8, 1>}, {transform_indices = @transform_1, window_bounds = array<i64: 8, 1>}, {pipeline_mode = #tpu.pipeline_mode<synchronous>, transform_indices = @transform_2, window_bounds = array<i64: 34, 128>}, {pipeline_mode = #tpu.pipeline_mode<synchronous>, transform_indices = @transform_3, window_bounds = array<i64: 1, 128>}, {pipeline_mode = #tpu.pipeline_mode<synchronous>, transform_indices = @transform_4, window_bounds = array<i64: 1, 128>}, {transform_indices = @transform_5, window_bounds = array<i64: 8, 128>}]} {
    %c0 = arith.constant 0 : index
    %c0_0 = arith.constant 0 : index
    %0 = vector.load %arg1[%c0, %c0_0] : memref<8x1xi32, #tpu.memory_space<vmem>>, vector<8x1xi32>
    %c0_1 = arith.constant 0 : index
    %c0_2 = arith.constant 0 : index
    %1 = vector.load %arg2[%c0_1, %c0_2] : memref<8x1xi32, #tpu.memory_space<vmem>>, vector<8x1xi32>
    %c32_i32 = arith.constant 32 : i32
    %2 = vector.broadcast %c32_i32 : i32 to vector<8x1xi32>
    %3 = arith.addi %1, %2 : vector<8x1xi32>
    %4 = tpu.iota {dimensions = array<i32: 1>} : vector<8x34xi32>
    %5 = vector.broadcast %0 : vector<8x1xi32> to vector<8x34xi32>
    %6 = arith.cmpi eq, %5, %4 : vector<8x34xi32>
    %7 = vector.broadcast %3 : vector<8x1xi32> to vector<8x34xi32>
    %8 = arith.cmpi eq, %7, %4 : vector<8x34xi32>
    %9 = arith.ori %6, %8 : vector<8x34xi1>
    %10 = arith.extui %9 : vector<8x34xi1> to vector<8x34xi32>
    %11 = arith.sitofp %10 : vector<8x34xi32> to vector<8x34xf32>
    %c0_3 = arith.constant 0 : index
    %c0_4 = arith.constant 0 : index
    %12 = vector.load %arg3[%c0_3, %c0_4] : memref<34x128xf32, #tpu.memory_space<vmem>>, vector<34x128xf32>
    %cst = arith.constant dense<0.000000e+00> : vector<8x128xf32>
    %13 = tpu.matmul %11, %12, %cst {dimension_numbers = #tpu.dot_dimension_numbers<[1], [0], [0], [1], [0, 0, 1, 1], [], []>} : vector<8x34xf32>, vector<34x128xf32>, vector<8x128xf32> -> vector<8x128xf32>
    %cst_5 = arith.constant dense<0.000000e+00> : vector<8xf32>
    %14 = vector.multi_reduction <add>, %13, %cst_5 [1] : vector<8x128xf32> to vector<8xf32>
    %15 = vector.shape_cast %14 : vector<8xf32> to vector<8x1xf32>
    %cst_6 = arith.constant 7.812500e-03 : f32
    %16 = vector.broadcast %cst_6 : f32 to vector<8x1xf32>
    %17 = arith.mulf %15, %16 : vector<8x1xf32>
    %18 = vector.broadcast %17 : vector<8x1xf32> to vector<8x128xf32>
    %19 = arith.subf %13, %18 : vector<8x128xf32>
    %20 = arith.mulf %19, %19 : vector<8x128xf32>
    %cst_7 = arith.constant dense<0.000000e+00> : vector<8xf32>
    %21 = vector.multi_reduction <add>, %20, %cst_7 [1] : vector<8x128xf32> to vector<8xf32>
    %22 = vector.shape_cast %21 : vector<8xf32> to vector<8x1xf32>
    %cst_8 = arith.constant 7.812500e-03 : f32
    %23 = vector.broadcast %cst_8 : f32 to vector<8x1xf32>
    %24 = arith.mulf %22, %23 : vector<8x1xf32>
    %cst_9 = arith.constant 9.99999996E-13 : f32
    %25 = vector.broadcast %cst_9 : f32 to vector<8x1xf32>
    %26 = arith.addf %24, %25 : vector<8x1xf32>
    %27 = math.rsqrt %26 : vector<8x1xf32>
    %28 = vector.broadcast %27 : vector<8x1xf32> to vector<8x128xf32>
    %29 = arith.mulf %19, %28 : vector<8x128xf32>
    %c0_10 = arith.constant 0 : index
    %c0_11 = arith.constant 0 : index
    %30 = vector.load %arg4[%c0_10, %c0_11] : memref<1x128xf32, #tpu.memory_space<vmem>>, vector<1x128xf32>
    %31 = vector.broadcast %30 : vector<1x128xf32> to vector<8x128xf32>
    %32 = arith.mulf %31, %29 : vector<8x128xf32>
    %c0_12 = arith.constant 0 : index
    %c0_13 = arith.constant 0 : index
    %33 = vector.load %arg5[%c0_12, %c0_13] : memref<1x128xf32, #tpu.memory_space<vmem>>, vector<1x128xf32>
    %34 = vector.broadcast %33 : vector<1x128xf32> to vector<8x128xf32>
    %35 = arith.addf %32, %34 : vector<8x128xf32>
    %c0_14 = arith.constant 0 : index
    %c0_15 = arith.constant 0 : index
    %36 = vector.load %arg6[%c0_14, %c0_15] : memref<8x128xf32, #tpu.memory_space<vmem>>, vector<8x128xf32>
    tpu.vector_store %arg6[%c0_14, %c0_15], %35 {strides = array<i32>} : memref<8x128xf32, #tpu.memory_space<vmem>>, vector<8x128xf32>,
    return
  }
  func.func @transform_0(%arg0: i32) -> (i32, i32) {
    %c0_i32 = arith.constant 0 : i32
    %c0_i32_0 = arith.constant 0 : i32
    return %arg0, %c0_i32 : i32, i32
  }
  func.func @transform_1(%arg0: i32) -> (i32, i32) {
    %c0_i32 = arith.constant 0 : i32
    %c0_i32_0 = arith.constant 0 : i32
    return %arg0, %c0_i32 : i32, i32
  }
  func.func @transform_2(%arg0: i32) -> (i32, i32) {
    %c0_i32 = arith.constant 0 : i32
    %c0_i32_0 = arith.constant 0 : i32
    %c0_i32_1 = arith.constant 0 : i32
    return %c0_i32, %c0_i32_0 : i32, i32
  }
  func.func @transform_3(%arg0: i32) -> (i32, i32) {
    %c0_i32 = arith.constant 0 : i32
    %c0_i32_0 = arith.constant 0 : i32
    %c0_i32_1 = arith.constant 0 : i32
    return %c0_i32, %c0_i32_0 : i32, i32
  }
  func.func @transform_4(%arg0: i32) -> (i32, i32) {
    %c0_i32 = arith.constant 0 : i32
    %c0_i32_0 = arith.constant 0 : i32
    %c0_i32_1 = arith.constant 0 : i32
    return %c0_i32, %c0_i32_0 : i32, i32
  }
  func.func @transform_5(%arg0: i32) -> (i32, i32) {
    %c0_i32 = arith.constant 0 : i32
    %c0_i32_0 = arith.constant 0 : i32
    return %arg0, %c0_i32 : i32, i32
  }
}

</mosaic_0001>

<bundles_post_ra>
// kernel: tpu_custom_call.1
= control target key start
LH: loop header
LB: loop body
LE: loop exit
PB: predicated region body
PF: predicated region fallthrough
CT: control target
= control target key end

     0   :  { %10 = vsyncpa [#allocation3], 0  ;;  %s814_s0 = inlined_call_operand.vmem [shape: s32[16,1], index: 0, kind: input, shape index: {}]   ;;  %s815_s1 = inlined_call_operand.vmem [shape: s32[16,1], index: 1, kind: input, shape index: {}]   ;;  %s816_s2 = inlined_call_operand.hbm [shape: f32[34,128], index: 2, kind: input, shape index: {}]   ;;  %s817_s3 = inlined_call_operand.vmem [shape: f32[1,128], index: 3, kind: input, shape index: {}]   ;;  %s818_s4 = inlined_call_operand.vmem [shape: f32[1,128], index: 4, kind: input, shape index: {}]   ;;  %s819_s5 = inlined_call_operand.hbm [shape: f32[16,128], index: 5, kind: output, shape index: {}]  }
   0x1   :  { %11 = vsyncpa [#allocation4], 0 }
   0x2   :  { %13 = vsyncpa [#allocation4 + $0x1], 0  ;;  %s700_s18 = smov 0   ;;  %s702_s19 = smov 0  }
   0x3   :  { %s704_s20 = smov 0   ;;  %s706_s21 = smov 0  }
   0x4 LB: > { %s721_s22 = sadd.s32 4294967295, %s661_s21   ;;  %s476_s23 = sadd.s32 4294967294, %s661_s21   ;;  %s661_s21 = sphi %s706_s21, %s827_s21   ;;  %s657_s20 = sphi %s704_s20, %s826_s20   ;;  %s653_s19 = sphi %s702_s19, %s825_s19   ;;  %s649_s18 = sphi %s700_s18, %s824_s18  }
   0x5   : > { %s725_s24 = sadd.s32 1, %s661_s21   ;;  %s141_s25 = sadd.s32 1, %s657_s20 }
   0x6   : > { %s138_s26 = ssub.s32 %s661_s21, %s725_s24  ;;  %p151_p0 = scmp.ne.s32.totalorder %s657_s20, %s653_s19 }
   0x7   : > { %p139_p1 = scmp.eq.s32.totalorder %s138_s26, 0  ;;  %p152_p2 = scmp.eq.s32.totalorder %s721_s22, 1 }
   0x8   : > { %p157_p3 = scmp.ne.s32.totalorder %s653_s19, %s649_s18  ;;  %p158_p4 = scmp.eq.s32.totalorder %s476_s23, 1 }
   0x9   : > { %s736_s27 = scalar_select %p139_p1, %s657_s20, %s141_s25  }
   0xa   : > { %p738_p5 = por %p152_p2, %p151_p0  ;;  %p742_p6 = por %p158_p4, %p157_p3 }
   0xb   : > { %p477_p7 = scmp.ge.s32.totalorder %s661_s21, 1  ;;  %p165_p8 = scmp.lt.s32.totalorder %s661_s21, 3 }
   0xc   : > { %s821_s29 = scalar_select %p742_p6, 1, 0 }
   0xd   : > { %p527_p9 = scmp.eq.s32.totalorder %s721_s22, 0  ;;  %p749_p10 = pnand %p477_p7, %p165_p8 }
   0xe   : > { %s663_s6 = smov [#allocation2]  }
   0xf   : > { %s177_s7 = sshll.u32 %s663_s6, 4  ;;  %p519_p11 = pneg %p749_p10  ;;  %s178_s7 = int_to_ptr.vmem [resolvable:$true] %s177_s7 }
  0x10   : > { %s582_s8 = scalar_lea.vmem %s178_s7, 640  ;;  %p590_p3 = scmp.lt.s32.totalorder %s178_s7, %s178_s7 }
  0x11   : > { %p520_p12 = pnand %p527_p9, %p519_p11  ;;  %p583_p0 = scmp.ne.s32.totalorder %s178_s7, %s582_s8 }
  0x12   : > { %p591_p4 = scmp.lt.s32.totalorder %s582_s8, %s582_s8 }
  0x13   : > { %p573_p13 = pneg %p520_p12 }
  0x14   : > { %p592_p6 = por %p591_p4, %p590_p3 }
  0x15   : > { %p585_p1 = pnand %p583_p0, %p573_p13 }
  0x17   : > { %p586_p2 = pneg %p585_p1 }
  0x19   : > { %p593_p7 = pnand %p592_p6, %p586_p2 }
  0x1b   : > { %596 = shalt.err (!%p593_p7)
}
  0x1c   : > { %s664_s9 = smov 128   ;;  %s665_s10 = smov 8  }
  0x1d   : > { %522 = dma.hbm_to_vmem [thread:$0]  (!%p520_p12), %s816_s2, 640, %s178_s7, [#allocation3], %s664_s9, %s664_s9, %s665_s10  }
  0x1e   : > { %213 = sbr.rel (%p749_p10) target bundleno = 686 (0x2ae), region = 40 }
  0x23   : > { %640 = dma.done.wait (%p527_p9), [#allocation3], 640  }
  0x24   : > { %642 = vsyncadd (%p527_p9), [#allocation3], 4294966656  ;;  %p244_p8 = scmp.lt.s32.totalorder %s721_s22, 1  ;;  %v666_v0 = vmov 0   ;;  %v667_v1 = vmov 0.0   ;;  %vm277_vm0 = vcmask 1041408   ;;  %v255_v10 = vlaneseq }
  0x25   : > { %568 = vset.pattern.permute.xlu0 %v666_v0  ;;  %500 = vmatprep.subr.mxu0 %v667_v1  ;;  %v272_v4 = vld [vmem:[#allocation2 + $0x20] sm:$0x3]  ;;  %v271_v6 = vld [vmem:[#allocation2 + $0x18] sm:$0xff]  ;;  %v270_v7 = vld [vmem:[#allocation2 + $0x10] sm:$0xff]  ;;  %vm668_vm1 = vmmov 0   ;;  %vm273_vm4 = vcmask 277504  }
  0x26   : > { %s245_s13 = scalar_select %p244_p8, %s721_s22, 1  ;;  %501 = vmatpush3.msk.msra.mxu0 %vm277_vm0, %v272_v4  ;;  %510 = vmatprep.mubr.msk.f32.mxu0 %vm668_vm1, %v667_v1  ;;  %v269_v8 = vld [vmem:[#allocation2 + $0x8] sm:$0xff]  ;;  %v268_v9 = vld [vmem:[#allocation2] sm:$0xff]  ;;  %v256_v12 = vand.u32 127, %v255_v10 }
  0x27   : > { %502 = vmatprep.subr.mxu0 %v667_v1  ;;  %s241_s30 = sand.u32 1, %s653_s19   ;;  %v488_v25 = vld [vmem:[%s817_s3] ss:$0 sm:$0xff]  ;;  %s491_s11 = sshll.u32 %s721_s22, 7 }
  0x28   : > { %s483_s14 = sshll.u32 %s245_s13, 3  ;;  %503 = vmatpush3.msra.mxu0 %v271_v6  ;;  %s482_s6 = sshll.u32 %s241_s30, 3  ;;  %v489_v27 = vld [vmem:[%s818_s4] ss:$0 sm:$0xff] }
  0x29   : > { %s247_s17 = scalar_lea.vmem %s814_s0, %s483_s14  ;;  %s251_s26 = scalar_lea.vmem %s815_s1, %s483_s14  ;;  %504 = vmatprep.subr.mxu0 %v667_v1 }
  0x2a   : > { %v252_v2 = vld [vmem:[%s247_s17] sm:$0xff]  ;;  %505 = vmatpush3.msra.mxu0 %v270_v7  ;;  %s243_s12 = scalar_lea.vmem [#allocation5], %s482_s6  ;;  %s391_s16 = scalar_lea.hbm %s819_s5, %s491_s11 }
  0x2b   : > { %v253_v3 = vld [vmem:[%s251_s26] sm:$0xff]  ;;  %258 = vperm.xlu0 %568, %v252_v2   ;;  %506 = vmatprep.subr.mxu0 %v667_v1  ;;  %s393_s13 = sshll.u32 %s243_s12, 4  ;;  %s380_s17 = scalar_lea.sflag [#allocation4], %s241_s30  ;;  %s394_s13 = int_to_ptr.vmem [resolvable:$true] %s393_s13 }
  0x2c   : > { %v254_v5 = vadd.s32 32, %v253_v3  ;;  %507 = vmatpush3.msra.mxu0 %v269_v8  ;;  %s597_s23 = scalar_lea.vmem %s394_s13, 128  ;;  %s669_s25 = smov [#allocation5]  }
  0x2d   : > { %508 = vmatprep.subr.mxu0 %v667_v1  ;;  %p598_p6 = scmp.ne.s32.totalorder %s394_s13, %s597_s23  ;;  %s601_s26 = sshll.u32 %s669_s25, 4  ;;  %s602_s26 = int_to_ptr.vmem [resolvable:$false] %s601_s26 }
  0x2e   : > { %509 = vmatpush3.msra.mxu0 %v268_v9  ;;  %s603_s22 = scalar_lea.vmem %s602_s26, 256  ;;  %p604_p11 = scmp.lt.s32.totalorder %s394_s13, %s602_s26 }
  0x2f   : > { %262 = vperm.xlu0 %568, %v254_v5   ;;  %p599_p9 = pnand %p598_p6, %p738_p5  ;;  %p605_p12 = scmp.lt.s32.totalorder %s603_s22, %s597_s23 }
  0x31   : > { %p600_p10 = pneg %p599_p9  ;;  %p606_p13 = por %p605_p12, %p604_p11 }
  0x33   : > { %p607_p0 = pnand %p606_p13, %p600_p10 }
  0xa6   : > { %v259_v11 = vpop.permute.xlu0 %258 }
  0xa7   : > { %vm260_vm2 = vcmp.eq.s32.totalorder %v259_v11, %v256_v12 }
  0xaa   : > { %v263_v13 = vpop.permute.xlu0 %262 }
  0xab   : > { %vm264_vm3 = vcmp.eq.s32.totalorder %v263_v13, %v256_v12 }
  0xac   : > { %vm265_vm5 = vmor %vm260_vm2, %vm264_vm3 }
  0xad   : > { %v485_v14 = vsel %vm265_vm5, 1.0, %v667_v1 }
  0xae   : > { %511 = vmatmul.mubr.msk.f32.vlgmr.msra.gmra.mxu0 %vm273_vm4, %v485_v14 }
 0x16e   : > { %v347_v15 = vpop.f32.mrf.mxu0 }
 0x16f   : > { %351 = vadd.xlane.f32.xlu1 %v347_v15 }
 0x170   : > { %v512_v16 = vpop.f32.mrf.mxu0 }
 0x1f8   : > { %v352_v17 = vpop.xlane.xlu1 %351 }
 0x1f9   : > { %v353_v18 = vmul.f32 0.0078125, %v352_v17 }
 0x1fb   : > { %v354_v19 = vsub.f32 %v347_v15, %v353_v18 }
 0x1fd   : > { %v355_v20 = vmul.f32 %v354_v19, %v354_v19 }
 0x1ff   : > { %356 = vadd.xlane.f32.xlu1 %v355_v20 }
 0x288   : > { %v357_v21 = vpop.xlane.xlu1 %356 }
 0x289   : > { %v358_v22 = vmul.f32 0.0078125, %v357_v21 }
 0x28b   : > { %v359_v23 = vadd.f32 1e-12, %v358_v22 }
 0x28d   : > { %569 = vrsqrt.f32 %v359_v23 }
 0x29a   : > { %v570_v24 = vpop.eup %569 }
 0x29b   : > { %v361_v26 = vmul.f32 %v570_v24, %v354_v19 }
 0x29d   : > { %v369_v28 = vmul.f32 %v488_v25, %v361_v26 }
 0x29f   : > { %v377_v29 = vadd.f32 %v489_v27, %v369_v28 }
 0x2a1   : > { %378 = vst [vmem:[%s243_s12] sm:$0xff] %v377_v29 }
 0x2a2   : > { %610 = shalt.err (!%p607_p0)
}
 0x2a3   : > { %s611_s6 = scalar_lea.hbm %s391_s16, 128  ;;  %s615_s8 = scalar_lea.hbm %s819_s5, 256 }
 0x2a4   : > { %p612_p1 = scmp.ne.s32.totalorder %s391_s16, %s611_s6  ;;  %p616_p4 = scmp.lt.s32.totalorder %s391_s16, %s819_s5 }
 0x2a5   : > { %p617_p7 = scmp.lt.s32.totalorder %s615_s8, %s611_s6 }
 0x2a6   : > { %p613_p2 = pnand %p612_p1, %p738_p5 }
 0x2a7   : > { %p618_p8 = por %p617_p7, %p616_p4 }
 0x2a8   : > { %p614_p3 = pneg %p613_p2 }
 0x2aa   : > { %p619_p6 = pnand %p618_p8, %p614_p3 }
 0x2ac   : > { %622 = shalt.err (!%p619_p6)
}
 0x2ad   : > { %517 = dma.vmem_to_hbm [thread:$0]  (%p738_p5), %s394_s13, 128, %s391_s16, %s380_s17  }
 0x2ae PF: > { %p529_p9 = scmp.ge.s32.totalorder %s661_s21, 2  ;;  %s405_s11 = sand.u32 1, %s649_s18  }
 0x2af   : > { %p823_p10 = scmp.ne.s32.totalorder %s821_s29, 0  ;;  %s406_s12 = scalar_lea.sflag [#allocation4], %s405_s11 }
 0x2b1   : > { %p524_p11 = pnand %p529_p9, %p823_p10 }
 0x2b3   : > { %p525_p12 = pneg %p524_p11 }
 0x2b5   : > { %644 = dma.done.wait (%p525_p12), %s406_s12, 128  }
 0x2b6   : > { %646 = vsyncadd (%p525_p12), %s406_s12, 4294967168  ;;  %p16_p13 = scmp.ge.s32.totalorder %s725_s24, 4   ;;  %s824_s18 = smov %s653_s19 }
 0x2b7   : > { %s825_s19 = smov %s657_s20  ;;  %s826_s20 = smov %s736_s27 }
 0x2b8   : > { %s827_s21 = smov %s725_s24  ;;  %18 = sbr.rel (!%p16_p13) target bundleno = 4 (0x4), region = 83 }
 0x2bd   :  { %411 = vsyncpa [#allocation3], 1 }
 0x2be   :  { %413 = vsyncpa [#allocation3 + $0x1], 1 }
 0x2bf   :  { %414 = vsyncpa [#allocation4], 1 }
 0x2c0   :  { %416 = vsyncpa [#allocation4 + $0x1], 1 }

</bundles_post_ra>
